<compile_context>
chip_gen: v5e
topology: v5e:2x2
jax: 0.10.0
libtpu: 0.0.40
codegen_flags: <defaults>
</compile_context>

<pallas_src>
import functools

import jax
import jax.numpy as jnp
import numpy as np
from jax.experimental import pallas as pl
from jax.experimental.pallas import tpu as pltpu


def simple_model2_kernel(
    x_ref,                      # (S*Bp, F)  all timesteps, batch padded to Bp=8
    w1_ref, b1_ref,             # (F, F), (1, F)
    w2_ref, b2_ref,             # (F, F), (1, F)
    w3_ref, b3_ref,             # (F, F), (1, F)
    wih_ref,                    # (F, 4F)   W_ih^T
    whh_ref,                    # (F, 4F)   W_hh^T
    blstm_ref,                  # (1, 4F)   b_ih + b_hh (pre-summed in wrapper)
    h0_ref, c0_ref,             # (Bp, F) initial LSTM state (padded)
    wout_ref, bout_ref,         # (F, NOUT), (1, NOUT)  lane-padded head
    out_ref,                    # (S*Bp, NOUT)  single lane-dense output slab
    h_all_scr,                  # VMEM scratch (S*Bp, F) — all hidden states
    *, seq_len, b_pad,
):
    feat = h0_ref.shape[-1]
    relu = lambda v: jnp.maximum(v, 0.0)

    x = x_ref[...]  # (S*Bp, F)

    # --- MLP hoisted out of the recurrence: 3 batched matmuls over all rows ---
    # (dropout p=0 => identity)
    p = relu(jnp.dot(x, w1_ref[...], preferred_element_type=jnp.float32) + b1_ref[...])
    p = relu(jnp.dot(p, w2_ref[...], preferred_element_type=jnp.float32) + b2_ref[...])
    p = relu(jnp.dot(p, w3_ref[...], preferred_element_type=jnp.float32) + b3_ref[...])

    # --- LSTM input projection hoisted out of the time loop (one matmul) ---
    # xg[t] = p_t @ W_ih^T + (b_ih + b_hh), shape (S*Bp, 4F)
    xg = jnp.dot(p, wih_ref[...], preferred_element_type=jnp.float32) + blstm_ref[...]

    # Hoist per-step xg slices off the serial chain; each slice is a fully
    # sublane-aligned (Bp, 4F) tile (Bp == 8).
    xg_slices = [xg[t * b_pad:(t + 1) * b_pad, :] for t in range(seq_len)]

    whh = whh_ref[...]
    h = h0_ref[...]
    c = c0_ref[...]

    # --- Serial recurrence: ONE small matmul per step (h @ W_hh^T) ---
    # Static unroll (seq_len small, known at trace time).
    for t in range(seq_len):
        gates = xg_slices[t] + jnp.dot(h, whh,
                                       preferred_element_type=jnp.float32)  # (Bp, 4F)
        # One sigmoid over the whole gate tile; PyTorch gate order: i, f, g, o.
        sig = jax.nn.sigmoid(gates)
        i_g = sig[:, 0 * feat:1 * feat]
        f_g = sig[:, 1 * feat:2 * feat]
        o_g = sig[:, 3 * feat:4 * feat]
        g_g = jnp.tanh(gates[:, 2 * feat:3 * feat])
        c = f_g * c + i_g * g_g
        h = o_g * jnp.tanh(c)
        # 8-row-aligned full-tile store; fully overwrites the scratch over the loop.
        h_all_scr[t * b_pad:(t + 1) * b_pad, :] = h

    # --- Output head after the loop: one batched matmul + one lane-dense store ---
    out = (jnp.dot(h_all_scr[...], wout_ref[...], preferred_element_type=jnp.float32)
           + bout_ref[...])
    out_ref[...] = relu(out)


def simple_model2_forward(x, params):
    """x: (S, B, F) float32 (seq, batch, feature — batch_first=False layout)."""
    S, B, F = x.shape
    T = params["wout_t"].shape[1]

    # Pad batch up to a sublane multiple (8) and the output head up to a lane
    # multiple (128) so every in-kernel store is an unmasked aligned vst.
    B_pad = max(8, pl.cdiv(B, 8) * 8)
    NOUT = max(128, pl.cdiv(T, 128) * 128)

    x_p = jnp.pad(x, ((0, 0), (0, B_pad - B), (0, 0))).reshape(S * B_pad, F)
    h0_p = jnp.pad(params["h0"], ((0, B_pad - B), (0, 0)))
    c0_p = jnp.pad(params["c0"], ((0, B_pad - B), (0, 0)))
    wout_p = jnp.pad(params["wout_t"], ((0, 0), (0, NOUT - T)))
    bout_p = jnp.pad(params["bout"], ((0, 0), (0, NOUT - T)))
    # Fuse the two LSTM biases in the wrapper (one fewer VPU add per step).
    blstm = params["bih"] + params["bhh"]

    vmem = pl.BlockSpec(memory_space=pltpu.MemorySpace.VMEM)
    kernel = functools.partial(simple_model2_kernel, seq_len=S, b_pad=B_pad)

    out2d = pl.pallas_call(
        kernel,
        out_shape=jax.ShapeDtypeStruct((S * B_pad, NOUT), jnp.float32),
        in_specs=[vmem] * 14,          # everything resident in VMEM, no pipelining
        out_specs=vmem,
        scratch_shapes=[pltpu.VMEM((S * B_pad, F), jnp.float32)],
    )(
        x_p,
        params["w1_t"], params["b1"],
        params["w2_t"], params["b2"],
        params["w3_t"], params["b3"],
        params["wih_t"], params["whh_t"], blstm,
        h0_p, c0_p,
        wout_p, bout_p,
    )
    # Drop batch/lane padding outside the kernel (free at the XLA level).
    return out2d.reshape(S, B_pad, NOUT)[:, :B, :T]


def reference_forward(x, params):
    """Pure-JAX reference matching PyTorch SimpleModel2.forward semantics."""
    relu = lambda v: jnp.maximum(v, 0.0)
    p = relu(x @ params["w1_t"] + params["b1"])
    p = relu(p @ params["w2_t"] + params["b2"])
    p = relu(p @ params["w3_t"] + params["b3"])

    F = params["h0"].shape[-1]

    def step(carry, x_t):
        h, c = carry
        gates = (x_t @ params["wih_t"] + params["bih"]
                 + h @ params["whh_t"] + params["bhh"])
        i_g = jax.nn.sigmoid(gates[:, 0 * F:1 * F])
        f_g = jax.nn.sigmoid(gates[:, 1 * F:2 * F])
        g_g = jnp.tanh(gates[:, 2 * F:3 * F])
        o_g = jax.nn.sigmoid(gates[:, 3 * F:4 * F])
        c_new = f_g * c + i_g * g_g
        h_new = o_g * jnp.tanh(c_new)
        return (h_new, c_new), h_new

    (_, _), hs = jax.lax.scan(step, (params["h0"], params["c0"]), p)
    return relu(hs @ params["wout_t"] + params["bout"])


if __name__ == "__main__":
    # Small shapes consistent with the module:
    #   person_count (batch) B=4, person_feature_size F=32, target_size T=16, seq S=8
    S, B, F, T = 8, 4, 32, 16

    key = jax.random.PRNGKey(0)
    keys = jax.random.split(key, 16)
    scale = 0.1

    params = {
        # Pre-transposed so kernel computes x @ W^T directly.
        "w1_t": scale * jax.random.normal(keys[0], (F, F), jnp.float32),
        "b1":   scale * jax.random.normal(keys[1], (1, F), jnp.float32),
        "w2_t": scale * jax.random.normal(keys[2], (F, F), jnp.float32),
        "b2":   scale * jax.random.normal(keys[3], (1, F), jnp.float32),
        "w3_t": scale * jax.random.normal(keys[4], (F, F), jnp.float32),
        "b3":   scale * jax.random.normal(keys[5], (1, F), jnp.float32),
        "wih_t": scale * jax.random.normal(keys[6], (F, 4 * F), jnp.float32),
        "whh_t": scale * jax.random.normal(keys[7], (F, 4 * F), jnp.float32),
        "bih":  scale * jax.random.normal(keys[8], (1, 4 * F), jnp.float32),
        "bhh":  scale * jax.random.normal(keys[9], (1, 4 * F), jnp.float32),
        "h0":   jax.random.normal(keys[10], (B, F), jnp.float32),   # self.hidden[0]
        "c0":   jax.random.normal(keys[11], (B, F), jnp.float32),   # self.cell_state[0]
        "wout_t": scale * jax.random.normal(keys[12], (F, T), jnp.float32),
        "bout":   scale * jax.random.normal(keys[13], (1, T), jnp.float32),
    }

    # personData: (seq, batch, feature) — PyTorch batch_first=False layout.
    x = jax.random.normal(keys[14], (S, B, F), jnp.float32)

    out = simple_model2_forward(x, params)
    out = jax.block_until_ready(out)

    ref = reference_forward(x, params)
    np.testing.assert_allclose(np.asarray(out), np.asarray(ref), atol=1e-4, rtol=1e-4)

    print("KERNEL_OK")
</pallas_src>

<mosaic_0001>
module attributes {stable_mosaic.version = 11 : i64} {
  func.func @simple_model2_kernel(%arg0: memref<64x32xf32, #tpu.memory_space<vmem>>, %arg1: memref<32x32xf32, #tpu.memory_space<vmem>>, %arg2: memref<1x32xf32, #tpu.memory_space<vmem>>, %arg3: memref<32x32xf32, #tpu.memory_space<vmem>>, %arg4: memref<1x32xf32, #tpu.memory_space<vmem>>, %arg5: memref<32x32xf32, #tpu.memory_space<vmem>>, %arg6: memref<1x32xf32, #tpu.memory_space<vmem>>, %arg7: memref<32x128xf32, #tpu.memory_space<vmem>>, %arg8: memref<32x128xf32, #tpu.memory_space<vmem>>, %arg9: memref<1x128xf32, #tpu.memory_space<vmem>>, %arg10: memref<8x32xf32, #tpu.memory_space<vmem>>, %arg11: memref<8x32xf32, #tpu.memory_space<vmem>>, %arg12: memref<32x128xf32, #tpu.memory_space<vmem>>, %arg13: memref<1x128xf32, #tpu.memory_space<vmem>>, %arg14: memref<64x128xf32, #tpu.memory_space<vmem>>, %arg15: memref<64x32xf32, #tpu.memory_space<vmem>>) attributes {dimension_semantics = [], scalar_prefetch = 0 : i64, scratch_operands = 1 : i64, tpu.core_type = #tpu.core_type<tc>} {
    %c0 = arith.constant 0 : index
    %c0_0 = arith.constant 0 : index
    %0 = vector.load %arg0[%c0, %c0_0] : memref<64x32xf32, #tpu.memory_space<vmem>>, vector<64x32xf32>
    %c0_1 = arith.constant 0 : index
    %c0_2 = arith.constant 0 : index
    %1 = vector.load %arg1[%c0_1, %c0_2] : memref<32x32xf32, #tpu.memory_space<vmem>>, vector<32x32xf32>
    %cst = arith.constant dense<0.000000e+00> : vector<64x32xf32>
    %2 = tpu.matmul %0, %1, %cst {dimension_numbers = #tpu.dot_dimension_numbers<[1], [0], [0], [1], [0, 0, 1, 1], [], []>} : vector<64x32xf32>, vector<32x32xf32>, vector<64x32xf32> -> vector<64x32xf32>
    %c0_3 = arith.constant 0 : index
    %c0_4 = arith.constant 0 : index
    %3 = vector.load %arg2[%c0_3, %c0_4] : memref<1x32xf32, #tpu.memory_space<vmem>>, vector<1x32xf32>
    %4 = vector.broadcast %3 : vector<1x32xf32> to vector<64x32xf32>
    %5 = arith.addf %2, %4 : vector<64x32xf32>
    %cst_5 = arith.constant 0.000000e+00 : f32
    %6 = vector.broadcast %cst_5 : f32 to vector<64x32xf32>
    %7 = arith.maximumf %5, %6 : vector<64x32xf32>
    %c0_6 = arith.constant 0 : index
    %c0_7 = arith.constant 0 : index
    %8 = vector.load %arg3[%c0_6, %c0_7] : memref<32x32xf32, #tpu.memory_space<vmem>>, vector<32x32xf32>
    %cst_8 = arith.constant dense<0.000000e+00> : vector<64x32xf32>
    %9 = tpu.matmul %7, %8, %cst_8 {dimension_numbers = #tpu.dot_dimension_numbers<[1], [0], [0], [1], [0, 0, 1, 1], [], []>} : vector<64x32xf32>, vector<32x32xf32>, vector<64x32xf32> -> vector<64x32xf32>
    %c0_9 = arith.constant 0 : index
    %c0_10 = arith.constant 0 : index
    %10 = vector.load %arg4[%c0_9, %c0_10] : memref<1x32xf32, #tpu.memory_space<vmem>>, vector<1x32xf32>
    %11 = vector.broadcast %10 : vector<1x32xf32> to vector<64x32xf32>
    %12 = arith.addf %9, %11 : vector<64x32xf32>
    %cst_11 = arith.constant 0.000000e+00 : f32
    %13 = vector.broadcast %cst_11 : f32 to vector<64x32xf32>
    %14 = arith.maximumf %12, %13 : vector<64x32xf32>
    %c0_12 = arith.constant 0 : index
    %c0_13 = arith.constant 0 : index
    %15 = vector.load %arg5[%c0_12, %c0_13] : memref<32x32xf32, #tpu.memory_space<vmem>>, vector<32x32xf32>
    %cst_14 = arith.constant dense<0.000000e+00> : vector<64x32xf32>
    %16 = tpu.matmul %14, %15, %cst_14 {dimension_numbers = #tpu.dot_dimension_numbers<[1], [0], [0], [1], [0, 0, 1, 1], [], []>} : vector<64x32xf32>, vector<32x32xf32>, vector<64x32xf32> -> vector<64x32xf32>
    %c0_15 = arith.constant 0 : index
    %c0_16 = arith.constant 0 : index
    %17 = vector.load %arg6[%c0_15, %c0_16] : memref<1x32xf32, #tpu.memory_space<vmem>>, vector<1x32xf32>
    %18 = vector.broadcast %17 : vector<1x32xf32> to vector<64x32xf32>
    %19 = arith.addf %16, %18 : vector<64x32xf32>
    %cst_17 = arith.constant 0.000000e+00 : f32
    %20 = vector.broadcast %cst_17 : f32 to vector<64x32xf32>
    %21 = arith.maximumf %19, %20 : vector<64x32xf32>
    %c0_18 = arith.constant 0 : index
    %c0_19 = arith.constant 0 : index
    %22 = vector.load %arg7[%c0_18, %c0_19] : memref<32x128xf32, #tpu.memory_space<vmem>>, vector<32x128xf32>
    %cst_20 = arith.constant dense<0.000000e+00> : vector<64x128xf32>
    %23 = tpu.matmul %21, %22, %cst_20 {dimension_numbers = #tpu.dot_dimension_numbers<[1], [0], [0], [1], [0, 0, 1, 1], [], []>} : vector<64x32xf32>, vector<32x128xf32>, vector<64x128xf32> -> vector<64x128xf32>
    %c0_21 = arith.constant 0 : index
    %c0_22 = arith.constant 0 : index
    %24 = vector.load %arg9[%c0_21, %c0_22] : memref<1x128xf32, #tpu.memory_space<vmem>>, vector<1x128xf32>
    %25 = vector.broadcast %24 : vector<1x128xf32> to vector<64x128xf32>
    %26 = arith.addf %23, %25 : vector<64x128xf32>
    %27 = vector.extract_strided_slice %26 {offsets = [0, 0], sizes = [8, 128], strides = [1, 1]} : vector<64x128xf32> to vector<8x128xf32>
    %28 = vector.extract_strided_slice %26 {offsets = [8, 0], sizes = [8, 128], strides = [1, 1]} : vector<64x128xf32> to vector<8x128xf32>
    %29 = vector.extract_strided_slice %26 {offsets = [16, 0], sizes = [8, 128], strides = [1, 1]} : vector<64x128xf32> to vector<8x128xf32>
    %30 = vector.extract_strided_slice %26 {offsets = [24, 0], sizes = [8, 128], strides = [1, 1]} : vector<64x128xf32> to vector<8x128xf32>
    %31 = vector.extract_strided_slice %26 {offsets = [32, 0], sizes = [8, 128], strides = [1, 1]} : vector<64x128xf32> to vector<8x128xf32>
    %32 = vector.extract_strided_slice %26 {offsets = [40, 0], sizes = [8, 128], strides = [1, 1]} : vector<64x128xf32> to vector<8x128xf32>
    %33 = vector.extract_strided_slice %26 {offsets = [48, 0], sizes = [8, 128], strides = [1, 1]} : vector<64x128xf32> to vector<8x128xf32>
    %34 = vector.extract_strided_slice %26 {offsets = [56, 0], sizes = [8, 128], strides = [1, 1]} : vector<64x128xf32> to vector<8x128xf32>
    %c0_23 = arith.constant 0 : index
    %c0_24 = arith.constant 0 : index
    %35 = vector.load %arg8[%c0_23, %c0_24] : memref<32x128xf32, #tpu.memory_space<vmem>>, vector<32x128xf32>
    %c0_25 = arith.constant 0 : index
    %c0_26 = arith.constant 0 : index
    %36 = vector.load %arg10[%c0_25, %c0_26] : memref<8x32xf32, #tpu.memory_space<vmem>>, vector<8x32xf32>
    %c0_27 = arith.constant 0 : index
    %c0_28 = arith.constant 0 : index
    %37 = vector.load %arg11[%c0_27, %c0_28] : memref<8x32xf32, #tpu.memory_space<vmem>>, vector<8x32xf32>
    %cst_29 = arith.constant dense<0.000000e+00> : vector<8x128xf32>
    %38 = tpu.matmul %36, %35, %cst_29 {dimension_numbers = #tpu.dot_dimension_numbers<[1], [0], [0], [1], [0, 0, 1, 1], [], []>} : vector<8x32xf32>, vector<32x128xf32>, vector<8x128xf32> -> vector<8x128xf32>
    %39 = arith.addf %27, %38 : vector<8x128xf32>
    %40 = arith.negf %39 : vector<8x128xf32>
    %41 = math.exp %40 : vector<8x128xf32>
    %cst_30 = arith.constant 1.000000e+00 : f32
    %42 = vector.broadcast %cst_30 : f32 to vector<8x128xf32>
    %43 = arith.addf %42, %41 : vector<8x128xf32>
    %44 = arith.divf %42, %43 : vector<8x128xf32>
    %45 = vector.extract_strided_slice %44 {offsets = [0, 0], sizes = [8, 32], strides = [1, 1]} : vector<8x128xf32> to vector<8x32xf32>
    %46 = vector.extract_strided_slice %44 {offsets = [0, 32], sizes = [8, 32], strides = [1, 1]} : vector<8x128xf32> to vector<8x32xf32>
    %47 = vector.extract_strided_slice %44 {offsets = [0, 96], sizes = [8, 32], strides = [1, 1]} : vector<8x128xf32> to vector<8x32xf32>
    %48 = vector.extract_strided_slice %39 {offsets = [0, 64], sizes = [8, 32], strides = [1, 1]} : vector<8x128xf32> to vector<8x32xf32>
    %49 = math.tanh %48 : vector<8x32xf32>
    %50 = arith.mulf %46, %37 : vector<8x32xf32>
    %51 = arith.mulf %45, %49 : vector<8x32xf32>
    %52 = arith.addf %50, %51 : vector<8x32xf32>
    %53 = math.tanh %52 : vector<8x32xf32>
    %54 = arith.mulf %47, %53 : vector<8x32xf32>
    %c0_31 = arith.constant 0 : index
    %c0_32 = arith.constant 0 : index
    %55 = vector.load %arg15[%c0_31, %c0_32] : memref<64x32xf32, #tpu.memory_space<vmem>>, vector<8x32xf32>
    tpu.vector_store %arg15[%c0_31, %c0_32], %54 {strides = array<i32>} : memref<64x32xf32, #tpu.memory_space<vmem>>, vector<8x32xf32>,
    %cst_33 = arith.constant dense<0.000000e+00> : vector<8x128xf32>
    %56 = tpu.matmul %54, %35, %cst_33 {dimension_numbers = #tpu.dot_dimension_numbers<[1], [0], [0], [1], [0, 0, 1, 1], [], []>} : vector<8x32xf32>, vector<32x128xf32>, vector<8x128xf32> -> vector<8x128xf32>
    %57 = arith.addf %28, %56 : vector<8x128xf32>
    %58 = arith.negf %57 : vector<8x128xf32>
    %59 = math.exp %58 : vector<8x128xf32>
    %cst_34 = arith.constant 1.000000e+00 : f32
    %60 = vector.broadcast %cst_34 : f32 to vector<8x128xf32>
    %61 = arith.addf %60, %59 : vector<8x128xf32>
    %62 = arith.divf %60, %61 : vector<8x128xf32>
    %63 = vector.extract_strided_slice %62 {offsets = [0, 0], sizes = [8, 32], strides = [1, 1]} : vector<8x128xf32> to vector<8x32xf32>
    %64 = vector.extract_strided_slice %62 {offsets = [0, 32], sizes = [8, 32], strides = [1, 1]} : vector<8x128xf32> to vector<8x32xf32>
    %65 = vector.extract_strided_slice %62 {offsets = [0, 96], sizes = [8, 32], strides = [1, 1]} : vector<8x128xf32> to vector<8x32xf32>
    %66 = vector.extract_strided_slice %57 {offsets = [0, 64], sizes = [8, 32], strides = [1, 1]} : vector<8x128xf32> to vector<8x32xf32>
    %67 = math.tanh %66 : vector<8x32xf32>
    %68 = arith.mulf %64, %52 : vector<8x32xf32>
    %69 = arith.mulf %63, %67 : vector<8x32xf32>
    %70 = arith.addf %68, %69 : vector<8x32xf32>
    %71 = math.tanh %70 : vector<8x32xf32>
    %72 = arith.mulf %65, %71 : vector<8x32xf32>
    %c8 = arith.constant 8 : index
    %c0_35 = arith.constant 0 : index
    %73 = vector.load %arg15[%c8, %c0_35] : memref<64x32xf32, #tpu.memory_space<vmem>>, vector<8x32xf32>
    tpu.vector_store %arg15[%c8, %c0_35], %72 {strides = array<i32>} : memref<64x32xf32, #tpu.memory_space<vmem>>, vector<8x32xf32>,
    %cst_36 = arith.constant dense<0.000000e+00> : vector<8x128xf32>
    %74 = tpu.matmul %72, %35, %cst_36 {dimension_numbers = #tpu.dot_dimension_numbers<[1], [0], [0], [1], [0, 0, 1, 1], [], []>} : vector<8x32xf32>, vector<32x128xf32>, vector<8x128xf32> -> vector<8x128xf32>
    %75 = arith.addf %29, %74 : vector<8x128xf32>
    %76 = arith.negf %75 : vector<8x128xf32>
    %77 = math.exp %76 : vector<8x128xf32>
    %cst_37 = arith.constant 1.000000e+00 : f32
    %78 = vector.broadcast %cst_37 : f32 to vector<8x128xf32>
    %79 = arith.addf %78, %77 : vector<8x128xf32>
    %80 = arith.divf %78, %79 : vector<8x128xf32>
    %81 = vector.extract_strided_slice %80 {offsets = [0, 0], sizes = [8, 32], strides = [1, 1]} : vector<8x128xf32> to vector<8x32xf32>
    %82 = vector.extract_strided_slice %80 {offsets = [0, 32], sizes = [8, 32], strides = [1, 1]} : vector<8x128xf32> to vector<8x32xf32>
    %83 = vector.extract_strided_slice %80 {offsets = [0, 96], sizes = [8, 32], strides = [1, 1]} : vector<8x128xf32> to vector<8x32xf32>
    %84 = vector.extract_strided_slice %75 {offsets = [0, 64], sizes = [8, 32], strides = [1, 1]} : vector<8x128xf32> to vector<8x32xf32>
    %85 = math.tanh %84 : vector<8x32xf32>
    %86 = arith.mulf %82, %70 : vector<8x32xf32>
    %87 = arith.mulf %81, %85 : vector<8x32xf32>
    %88 = arith.addf %86, %87 : vector<8x32xf32>
    %89 = math.tanh %88 : vector<8x32xf32>
    %90 = arith.mulf %83, %89 : vector<8x32xf32>
    %c16 = arith.constant 16 : index
    %c0_38 = arith.constant 0 : index
    %91 = vector.load %arg15[%c16, %c0_38] : memref<64x32xf32, #tpu.memory_space<vmem>>, vector<8x32xf32>
    tpu.vector_store %arg15[%c16, %c0_38], %90 {strides = array<i32>} : memref<64x32xf32, #tpu.memory_space<vmem>>, vector<8x32xf32>,
    %cst_39 = arith.constant dense<0.000000e+00> : vector<8x128xf32>
    %92 = tpu.matmul %90, %35, %cst_39 {dimension_numbers = #tpu.dot_dimension_numbers<[1], [0], [0], [1], [0, 0, 1, 1], [], []>} : vector<8x32xf32>, vector<32x128xf32>, vector<8x128xf32> -> vector<8x128xf32>
    %93 = arith.addf %30, %92 : vector<8x128xf32>
    %94 = arith.negf %93 : vector<8x128xf32>
    %95 = math.exp %94 : vector<8x128xf32>
    %cst_40 = arith.constant 1.000000e+00 : f32
    %96 = vector.broadcast %cst_40 : f32 to vector<8x128xf32>
    %97 = arith.addf %96, %95 : vector<8x128xf32>
    %98 = arith.divf %96, %97 : vector<8x128xf32>
    %99 = vector.extract_strided_slice %98 {offsets = [0, 0], sizes = [8, 32], strides = [1, 1]} : vector<8x128xf32> to vector<8x32xf32>
    %100 = vector.extract_strided_slice %98 {offsets = [0, 32], sizes = [8, 32], strides = [1, 1]} : vector<8x128xf32> to vector<8x32xf32>
    %101 = vector.extract_strided_slice %98 {offsets = [0, 96], sizes = [8, 32], strides = [1, 1]} : vector<8x128xf32> to vector<8x32xf32>
    %102 = vector.extract_strided_slice %93 {offsets = [0, 64], sizes = [8, 32], strides = [1, 1]} : vector<8x128xf32> to vector<8x32xf32>
    %103 = math.tanh %102 : vector<8x32xf32>
    %104 = arith.mulf %100, %88 : vector<8x32xf32>
    %105 = arith.mulf %99, %103 : vector<8x32xf32>
    %106 = arith.addf %104, %105 : vector<8x32xf32>
    %107 = math.tanh %106 : vector<8x32xf32>
    %108 = arith.mulf %101, %107 : vector<8x32xf32>
    %c24 = arith.constant 24 : index
    %c0_41 = arith.constant 0 : index
    %109 = vector.load %arg15[%c24, %c0_41] : memref<64x32xf32, #tpu.memory_space<vmem>>, vector<8x32xf32>
    tpu.vector_store %arg15[%c24, %c0_41], %108 {strides = array<i32>} : memref<64x32xf32, #tpu.memory_space<vmem>>, vector<8x32xf32>,
    %cst_42 = arith.constant dense<0.000000e+00> : vector<8x128xf32>
    %110 = tpu.matmul %108, %35, %cst_42 {dimension_numbers = #tpu.dot_dimension_numbers<[1], [0], [0], [1], [0, 0, 1, 1], [], []>} : vector<8x32xf32>, vector<32x128xf32>, vector<8x128xf32> -> vector<8x128xf32>
    %111 = arith.addf %31, %110 : vector<8x128xf32>
    %112 = arith.negf %111 : vector<8x128xf32>
    %113 = math.exp %112 : vector<8x128xf32>
    %cst_43 = arith.constant 1.000000e+00 : f32
    %114 = vector.broadcast %cst_43 : f32 to vector<8x128xf32>
    %115 = arith.addf %114, %113 : vector<8x128xf32>
    %116 = arith.divf %114, %115 : vector<8x128xf32>
    %117 = vector.extract_strided_slice %116 {offsets = [0, 0], sizes = [8, 32], strides = [1, 1]} : vector<8x128xf32> to vector<8x32xf32>
    %118 = vector.extract_strided_slice %116 {offsets = [0, 32], sizes = [8, 32], strides = [1, 1]} : vector<8x128xf32> to vector<8x32xf32>
    %119 = vector.extract_strided_slice %116 {offsets = [0, 96], sizes = [8, 32], strides = [1, 1]} : vector<8x128xf32> to vector<8x32xf32>
    %120 = vector.extract_strided_slice %111 {offsets = [0, 64], sizes = [8, 32], strides = [1, 1]} : vector<8x128xf32> to vector<8x32xf32>
    %121 = math.tanh %120 : vector<8x32xf32>
    %122 = arith.mulf %118, %106 : vector<8x32xf32>
    %123 = arith.mulf %117, %121 : vector<8x32xf32>
    %124 = arith.addf %122, %123 : vector<8x32xf32>
    %125 = math.tanh %124 : vector<8x32xf32>
    %126 = arith.mulf %119, %125 : vector<8x32xf32>
    %c32 = arith.constant 32 : index
    %c0_44 = arith.constant 0 : index
    %127 = vector.load %arg15[%c32, %c0_44] : memref<64x32xf32, #tpu.memory_space<vmem>>, vector<8x32xf32>
    tpu.vector_store %arg15[%c32, %c0_44], %126 {strides = array<i32>} : memref<64x32xf32, #tpu.memory_space<vmem>>, vector<8x32xf32>,
    %cst_45 = arith.constant dense<0.000000e+00> : vector<8x128xf32>
    %128 = tpu.matmul %126, %35, %cst_45 {dimension_numbers = #tpu.dot_dimension_numbers<[1], [0], [0], [1], [0, 0, 1, 1], [], []>} : vector<8x32xf32>, vector<32x128xf32>, vector<8x128xf32> -> vector<8x128xf32>
    %129 = arith.addf %32, %128 : vector<8x128xf32>
    %130 = arith.negf %129 : vector<8x128xf32>
    %131 = math.exp %130 : vector<8x128xf32>
    %cst_46 = arith.constant 1.000000e+00 : f32
    %132 = vector.broadcast %cst_46 : f32 to vector<8x128xf32>
    %133 = arith.addf %132, %131 : vector<8x128xf32>
    %134 = arith.divf %132, %133 : vector<8x128xf32>
    %135 = vector.extract_strided_slice %134 {offsets = [0, 0], sizes = [8, 32], strides = [1, 1]} : vector<8x128xf32> to vector<8x32xf32>
    %136 = vector.extract_strided_slice %134 {offsets = [0, 32], sizes = [8, 32], strides = [1, 1]} : vector<8x128xf32> to vector<8x32xf32>
    %137 = vector.extract_strided_slice %134 {offsets = [0, 96], sizes = [8, 32], strides = [1, 1]} : vector<8x128xf32> to vector<8x32xf32>
    %138 = vector.extract_strided_slice %129 {offsets = [0, 64], sizes = [8, 32], strides = [1, 1]} : vector<8x128xf32> to vector<8x32xf32>
    %139 = math.tanh %138 : vector<8x32xf32>
    %140 = arith.mulf %136, %124 : vector<8x32xf32>
    %141 = arith.mulf %135, %139 : vector<8x32xf32>
    %142 = arith.addf %140, %141 : vector<8x32xf32>
    %143 = math.tanh %142 : vector<8x32xf32>
    %144 = arith.mulf %137, %143 : vector<8x32xf32>
    %c40 = arith.constant 40 : index
    %c0_47 = arith.constant 0 : index
    %145 = vector.load %arg15[%c40, %c0_47] : memref<64x32xf32, #tpu.memory_space<vmem>>, vector<8x32xf32>
    tpu.vector_store %arg15[%c40, %c0_47], %144 {strides = array<i32>} : memref<64x32xf32, #tpu.memory_space<vmem>>, vector<8x32xf32>,
    %cst_48 = arith.constant dense<0.000000e+00> : vector<8x128xf32>
    %146 = tpu.matmul %144, %35, %cst_48 {dimension_numbers = #tpu.dot_dimension_numbers<[1], [0], [0], [1], [0, 0, 1, 1], [], []>} : vector<8x32xf32>, vector<32x128xf32>, vector<8x128xf32> -> vector<8x128xf32>
    %147 = arith.addf %33, %146 : vector<8x128xf32>
    %148 = arith.negf %147 : vector<8x128xf32>
    %149 = math.exp %148 : vector<8x128xf32>
    %cst_49 = arith.constant 1.000000e+00 : f32
    %150 = vector.broadcast %cst_49 : f32 to vector<8x128xf32>
    %151 = arith.addf %150, %149 : vector<8x128xf32>
    %152 = arith.divf %150, %151 : vector<8x128xf32>
    %153 = vector.extract_strided_slice %152 {offsets = [0, 0], sizes = [8, 32], strides = [1, 1]} : vector<8x128xf32> to vector<8x32xf32>
    %154 = vector.extract_strided_slice %152 {offsets = [0, 32], sizes = [8, 32], strides = [1, 1]} : vector<8x128xf32> to vector<8x32xf32>
    %155 = vector.extract_strided_slice %152 {offsets = [0, 96], sizes = [8, 32], strides = [1, 1]} : vector<8x128xf32> to vector<8x32xf32>
    %156 = vector.extract_strided_slice %147 {offsets = [0, 64], sizes = [8, 32], strides = [1, 1]} : vector<8x128xf32> to vector<8x32xf32>
    %157 = math.tanh %156 : vector<8x32xf32>
    %158 = arith.mulf %154, %142 : vector<8x32xf32>
    %159 = arith.mulf %153, %157 : vector<8x32xf32>
    %160 = arith.addf %158, %159 : vector<8x32xf32>
    %161 = math.tanh %160 : vector<8x32xf32>
    %162 = arith.mulf %155, %161 : vector<8x32xf32>
    %c48 = arith.constant 48 : index
    %c0_50 = arith.constant 0 : index
    %163 = vector.load %arg15[%c48, %c0_50] : memref<64x32xf32, #tpu.memory_space<vmem>>, vector<8x32xf32>
    tpu.vector_store %arg15[%c48, %c0_50], %162 {strides = array<i32>} : memref<64x32xf32, #tpu.memory_space<vmem>>, vector<8x32xf32>,
    %cst_51 = arith.constant dense<0.000000e+00> : vector<8x128xf32>
    %164 = tpu.matmul %162, %35, %cst_51 {dimension_numbers = #tpu.dot_dimension_numbers<[1], [0], [0], [1], [0, 0, 1, 1], [], []>} : vector<8x32xf32>, vector<32x128xf32>, vector<8x128xf32> -> vector<8x128xf32>
    %165 = arith.addf %34, %164 : vector<8x128xf32>
    %166 = arith.negf %165 : vector<8x128xf32>
    %167 = math.exp %166 : vector<8x128xf32>
    %cst_52 = arith.constant 1.000000e+00 : f32
    %168 = vector.broadcast %cst_52 : f32 to vector<8x128xf32>
    %169 = arith.addf %168, %167 : vector<8x128xf32>
    %170 = arith.divf %168, %169 : vector<8x128xf32>
    %171 = vector.extract_strided_slice %170 {offsets = [0, 0], sizes = [8, 32], strides = [1, 1]} : vector<8x128xf32> to vector<8x32xf32>
    %172 = vector.extract_strided_slice %170 {offsets = [0, 32], sizes = [8, 32], strides = [1, 1]} : vector<8x128xf32> to vector<8x32xf32>
    %173 = vector.extract_strided_slice %170 {offsets = [0, 96], sizes = [8, 32], strides = [1, 1]} : vector<8x128xf32> to vector<8x32xf32>
    %174 = vector.extract_strided_slice %165 {offsets = [0, 64], sizes = [8, 32], strides = [1, 1]} : vector<8x128xf32> to vector<8x32xf32>
    %175 = math.tanh %174 : vector<8x32xf32>
    %176 = arith.mulf %172, %160 : vector<8x32xf32>
    %177 = arith.mulf %171, %175 : vector<8x32xf32>
    %178 = arith.addf %176, %177 : vector<8x32xf32>
    %179 = math.tanh %178 : vector<8x32xf32>
    %180 = arith.mulf %173, %179 : vector<8x32xf32>
    %c56 = arith.constant 56 : index
    %c0_53 = arith.constant 0 : index
    %181 = vector.load %arg15[%c56, %c0_53] : memref<64x32xf32, #tpu.memory_space<vmem>>, vector<8x32xf32>
    tpu.vector_store %arg15[%c56, %c0_53], %180 {strides = array<i32>} : memref<64x32xf32, #tpu.memory_space<vmem>>, vector<8x32xf32>,
    %c0_54 = arith.constant 0 : index
    %c0_55 = arith.constant 0 : index
    %182 = vector.load %arg15[%c0_54, %c0_55] : memref<64x32xf32, #tpu.memory_space<vmem>>, vector<64x32xf32>
    %c0_56 = arith.constant 0 : index
    %c0_57 = arith.constant 0 : index
    %183 = vector.load %arg12[%c0_56, %c0_57] : memref<32x128xf32, #tpu.memory_space<vmem>>, vector<32x128xf32>
    %cst_58 = arith.constant dense<0.000000e+00> : vector<64x128xf32>
    %184 = tpu.matmul %182, %183, %cst_58 {dimension_numbers = #tpu.dot_dimension_numbers<[1], [0], [0], [1], [0, 0, 1, 1], [], []>} : vector<64x32xf32>, vector<32x128xf32>, vector<64x128xf32> -> vector<64x128xf32>
    %c0_59 = arith.constant 0 : index
    %c0_60 = arith.constant 0 : index
    %185 = vector.load %arg13[%c0_59, %c0_60] : memref<1x128xf32, #tpu.memory_space<vmem>>, vector<1x128xf32>
    %186 = vector.broadcast %185 : vector<1x128xf32> to vector<64x128xf32>
    %187 = arith.addf %184, %186 : vector<64x128xf32>
    %cst_61 = arith.constant 0.000000e+00 : f32
    %188 = vector.broadcast %cst_61 : f32 to vector<64x128xf32>
    %189 = arith.maximumf %187, %188 : vector<64x128xf32>
    %c0_62 = arith.constant 0 : index
    %c0_63 = arith.constant 0 : index
    %190 = vector.load %arg14[%c0_62, %c0_63] : memref<64x128xf32, #tpu.memory_space<vmem>>, vector<64x128xf32>
    tpu.vector_store %arg14[%c0_62, %c0_63], %189 {strides = array<i32>} : memref<64x128xf32, #tpu.memory_space<vmem>>, vector<64x128xf32>,
    return
  }
}

</mosaic_0001>

<bundles_post_ra>
// kernel: tpu_custom_call.1
= control target key start
LH: loop header
LB: loop body
LE: loop exit
PB: predicated region body
PF: predicated region fallthrough
CT: control target
= control target key end

     0   :  { %19 = vsyncpa [#allocation4], 0  ;;  %s1829_s0 = inlined_call_operand.vmem [shape: f32[64,32], index: 0, kind: input, shape index: {}]   ;;  %s1830_s1 = inlined_call_operand.vmem [shape: f32[32,32], index: 1, kind: input, shape index: {}]   ;;  %s1831_s2 = inlined_call_operand.vmem [shape: f32[1,32], index: 2, kind: input, shape index: {}]   ;;  %s1832_s3 = inlined_call_operand.vmem [shape: f32[32,32], index: 3, kind: input, shape index: {}]   ;;  %s1833_s4 = inlined_call_operand.hbm [shape: f32[1,32], index: 4, kind: input, shape index: {}]   ;;  %s1834_s5 = inlined_call_operand.vmem [shape: f32[32,32], index: 5, kind: input, shape index: {}]   ;;  %s1835_s6 = inlined_call_operand.hbm [shape: f32[1,32], index: 6, kind: input, shape index: {}]   ;;  %s1836_s7 = inlined_call_operand.hbm [shape: f32[32,128], index: 7, kind: input, shape index: {}]   ;;  %s1837_s8 = inlined_call_operand.hbm [shape: f32[32,128], index: 8, kind: input, shape index: {}]   ;;  %s1838_s9 = inlined_call_operand.hbm [shape: f32[1,128], index: 9, kind: input, shape index: {}]   ;;  %s1839_s10 = inlined_call_operand.vmem [shape: f32[8,32], index: 10, kind: input, shape index: {}]   ;;  %s1840_s11 = inlined_call_operand.hbm [shape: f32[8,32], index: 11, kind: input, shape index: {}]   ;;  %s1841_s12 = inlined_call_operand.hbm [shape: f32[32,128], index: 12, kind: input, shape index: {}]   ;;  %s1842_s13 = inlined_call_operand.vmem [shape: f32[1,128], index: 13, kind: input, shape index: {}]   ;;  %s1843_s14 = inlined_call_operand.hbm [shape: f32[64,128], index: 14, kind: output, shape index: {}]  }
   0x1   :  { %20 = vsyncpa [#allocation7], 0 }
   0x2   :  { %21 = vsyncpa [#allocation10], 0 }
   0x3   :  { %22 = vsyncpa [#allocation13], 0  ;;  %s50_s15 = sshll.u32 %s1835_s6, 4  ;;  %s51_s15 = int_to_ptr.hbm [resolvable:$true] %s50_s15 }
   0x4   :  { %23 = vsyncpa [#allocation5], 0  ;;  %s1475_s16 = smov [#allocation6]   ;;  %s73_s20 = sshll.u32 %s1837_s8, 4  ;;  %s74_s20 = int_to_ptr.hbm [resolvable:$true] %s73_s20 }
   0x5   :  { %s52_s17 = sshll.u32 %s1475_s16, 4  ;;  %s1476_s21 = smov [#allocation9]   ;;  %s53_s17 = int_to_ptr.vmem [resolvable:$true] %s52_s17 }
   0x6   :  { %55 = dma.hbm_to_vmem [thread:$0]  %s51_s15, 16, %s53_s17, [#allocation7]  }
   0x7   :  { %s75_s22 = sshll.u32 %s1476_s21, 4  ;;  %s100_s25 = sshll.u32 %s1840_s11, 4  ;;  %s76_s22 = int_to_ptr.vmem [resolvable:$true] %s75_s22  ;;  %s101_s25 = int_to_ptr.hbm [resolvable:$true] %s100_s25 }
   0x8   :  { %s1477_s6 = smov 128   ;;  %s1478_s26 = smov 8  }
   0x9   :  { %81 = dma.hbm_to_vmem [thread:$0]  %s74_s20, 512, %s76_s22, [#allocation10], %s1477_s6, %s1477_s6, %s1478_s26  }
   0xa   :  { %s37_s29 = sshll.u32 %s1833_s4, 4  ;;  %s1479_s8 = smov [#allocation12]   ;;  %s38_s29 = int_to_ptr.hbm [resolvable:$true] %s37_s29 }
   0xb   :  { %s102_s30 = sshll.u32 %s1479_s8, 4  ;;  %s1480_s15 = smov [#allocation3]   ;;  %s103_s30 = int_to_ptr.vmem [resolvable:$true] %s102_s30 }
   0xc   :  { %105 = dma.hbm_to_vmem [thread:$0]  %s101_s25, 128, %s103_s30, [#allocation13]  }
   0xd   :  { %s39_s16 = sshll.u32 %s1480_s15, 4  ;;  %s60_s18 = sshll.u32 %s1836_s7, 4  ;;  %s40_s16 = int_to_ptr.vmem [resolvable:$true] %s39_s16  ;;  %s61_s18 = int_to_ptr.hbm [resolvable:$true] %s60_s18 }
   0xe   :  { %42 = dma.hbm_to_vmem [thread:$0]  %s38_s29, 16, %s40_s16, [#allocation4]  }
   0xf   :  { %s87_s21 = sshll.u32 %s1838_s9, 4  ;;  %s1481_s22 = smov [#allocation8]   ;;  %s88_s21 = int_to_ptr.hbm [resolvable:$true] %s87_s21 }
  0x10   :  { %s62_s4 = sshll.u32 %s1481_s22, 4  ;;  %s1482_s23 = smov [#allocation11]   ;;  %s63_s4 = int_to_ptr.vmem [resolvable:$true] %s62_s4 }
  0x11   :  { %68 = dma.hbm_to_vmem [thread:$0]  %s61_s18, 512, %s63_s4, [#allocation7], %s1477_s6, %s1477_s6, %s1478_s26  }
  0x12   :  { %s89_s24 = sshll.u32 %s1482_s23, 4  ;;  %s110_s7 = sshll.u32 %s1841_s12, 4  ;;  %s90_s24 = int_to_ptr.vmem [resolvable:$true] %s89_s24  ;;  %s111_s7 = int_to_ptr.hbm [resolvable:$true] %s110_s7 }
  0x13   :  { %92 = dma.hbm_to_vmem [thread:$0]  %s88_s21, 16, %s90_s24, [#allocation10]  }
  0x14   :  { %s1483_s28 = smov [#allocation14]  }
  0x15   :  { %s112_s29 = sshll.u32 %s1483_s28, 4  ;;  %s113_s29 = int_to_ptr.vmem [resolvable:$true] %s112_s29 }
  0x16   :  { %118 = dma.hbm_to_vmem [thread:$0]  %s111_s7, 512, %s113_s29, [#allocation13], %s1477_s6, %s1477_s6, %s1478_s26  }
  0x17   :  { %1465 = dma.done.wait [#allocation4], 16  }
  0x18   :  { %1466 = vsyncadd [#allocation4], 4294967280 }
  0x19   :  { %1467 = dma.done.wait [#allocation7], 528  }
  0x1a   :  { %1468 = vsyncadd [#allocation7], 4294966768 }
  0x1b   :  { %1469 = dma.done.wait [#allocation10], 528  }
  0x1c   :  { %1470 = vsyncadd [#allocation10], 4294966768 }
  0x1d   :  { %1471 = dma.done.wait [#allocation13], 640  }
  0x1e   :  { %1472 = vsyncadd [#allocation13], 4294966656  ;;  %v160_v0 = vld [vmem:[%s1830_s1 + $0x18] sm:$0xff]  ;;  %v159_v1 = vld [vmem:[%s1830_s1 + $0x10] sm:$0xff]  ;;  %vm165_vm0 = vcmask 261120   ;;  %s1485_s27 = smov 32  }
  0x1f   :  { %202 = vmatpush.msra.mxu0 %v160_v0  ;;  %1180 = vmatpush.msra.mxu1 %v160_v0  ;;  %v158_v2 = vld [vmem:[%s1830_s1 + $0x8] sm:$0xff]  ;;  %v157_v3 = vld [vmem:[%s1830_s1] sm:$0xff]  ;;  %v151_v5 = vld [vmem:[%s1829_s0 + $0x10] sm:$0xff]  ;;  %s1108_s8 = sshll.u32 %s1843_s14, 4  ;;  %s1109_s8 = int_to_ptr.hbm [resolvable:$true] %s1108_s8 }
  0x20   :  { %1181 = vmatpush.msra.mxu2 %v160_v0  ;;  %1182 = vmatpush.msra.mxu3 %v160_v0  ;;  %v149_v4 = vld [vmem:[%s1829_s0] sm:$0xff]  ;;  %v242_v6 = vld [vmem:[%s1832_s3 + $0x18] sm:$0xff]  ;;  %v241_v7 = vld [vmem:[%s1832_s3 + $0x10] sm:$0xff] }
  0x21   :  { %203 = vmatpush.msra.mxu0 %v159_v1  ;;  %1183 = vmatpush.msra.mxu1 %v159_v1  ;;  %v240_v8 = vld [vmem:[%s1832_s3 + $0x8] sm:$0xff]  ;;  %v152_v10 = vld [vmem:[%s1829_s0 + $0x18] sm:$0xff]  ;;  %v239_v11 = vld [vmem:[%s1832_s3] sm:$0xff] }
  0x22   :  { %1184 = vmatpush.msra.mxu2 %v159_v1  ;;  %1185 = vmatpush.msra.mxu3 %v159_v1  ;;  %v150_v9 = vld [vmem:[%s1829_s0 + $0x8] sm:$0xff]  ;;  %v153_v12 = vld [vmem:[%s1829_s0 + $0x20] sm:$0xff]  ;;  %v323_v13 = vld [vmem:[%s1834_s5 + $0x18] sm:$0xff] }
  0x23   :  { %204 = vmatpush.msra.mxu0 %v158_v2  ;;  %1186 = vmatpush.msra.mxu1 %v158_v2  ;;  %v322_v14 = vld [vmem:[%s1834_s5 + $0x10] sm:$0xff]  ;;  %v154_v15 = vld [vmem:[%s1829_s0 + $0x28] sm:$0xff]  ;;  %v1649_v16 = vld [vmem:[%s1831_s2] ss:$0 sm:$0xff] }
  0x24   :  { %1187 = vmatpush.msra.mxu2 %v158_v2  ;;  %1188 = vmatpush.msra.mxu3 %v158_v2  ;;  %v321_v17 = vld [vmem:[%s1834_s5 + $0x8] sm:$0xff]  ;;  %v320_v30 = vld [vmem:[%s1834_s5] sm:$0xff]  ;;  %v155_v34 = vld [vmem:[%s1829_s0 + $0x30] sm:$0xff] }
  0x25   :  { %205 = vmatpush.msra.mxu0 %v157_v3  ;;  %1189 = vmatpush.msra.mxu1 %v157_v3  ;;  %v404_v35 = vld [vmem:[#allocation8 + $0x18] sm:$0xff]  ;;  %v403_v38 = vld [vmem:[#allocation8 + $0x10] sm:$0xff]  ;;  %v402_v40 = vld [vmem:[#allocation8 + $0x8] sm:$0xff] }
  0x26   :  { %1124 = vmatmul.msk.f32.vlgmr.msra.gmra.mxu0 %vm165_vm0, %v149_v4  ;;  %1126 = vmatmul.msk.f32.vlgmr.msra.gmra.mxu1 %vm165_vm0, %v151_v5  ;;  %v1671_v36 = vld [vmem:[#allocation3] ss:$0 sm:$0xff]  ;;  %v156_v45 = vld [vmem:[%s1829_s0 + $0x38] sm:$0xff]  ;;  %v401_v56 = vld [vmem:[#allocation8] sm:$0xff] }
  0x27   :  { %283 = vmatpush.msrb.mxu1 %v242_v6  ;;  %1190 = vmatpush.msra.mxu2 %v157_v3  ;;  %v1674_v41 = vld [vmem:[#allocation9 + $0x18] sm:$0xff]  ;;  %v476_v57 = vld [vmem:[#allocation9 + $0x10] sm:$0xff]  ;;  %v475_v58 = vld [vmem:[#allocation9 + $0x8] sm:$0xff] }
  0x28   :  { %1191 = vmatpush.msra.mxu3 %v157_v3  ;;  %1128 = vmatmul.msk.f32.vlgmr.msra.gmra.mxu2 %vm165_vm0, %v153_v12  ;;  %v474_v59 = vld [vmem:[#allocation9] sm:$0xff]  ;;  %v1706_v6 = vld [vmem:[#allocation6] ss:$0 sm:$0xff] }
  0x29   :  { %284 = vmatpush.msrb.mxu1 %v241_v7  ;;  %364 = vmatpush.msrb.mxu2 %v323_v13  ;;  %v478_v60 = vld [vmem:[%s1839_s10] sm:$0xff]  ;;  %s1484_s10 = smov 64  }
  0x2a   :  { %1130 = vmatmul.msk.f32.vlgmr.msra.gmra.mxu3 %vm165_vm0, %v155_v34  ;;  %495 = vmatpush.msrb.mxu0 %v1674_v41 }
  0x2b   :  { %285 = vmatpush.msrb.mxu1 %v240_v8  ;;  %365 = vmatpush.msrb.mxu2 %v322_v14 }
  0x2c   :  { %445 = vmatpush.msrb.mxu3 %v404_v35  ;;  %496 = vmatpush.msrb.mxu0 %v476_v57 }
  0x2d   :  { %286 = vmatpush.msrb.mxu1 %v239_v11  ;;  %366 = vmatpush.msrb.mxu2 %v321_v17 }
  0x2e   :  { %1125 = vmatmul.msk.f32.gmra.mxu0 %vm165_vm0, %v150_v9  ;;  %1127 = vmatmul.msk.f32.gmra.mxu1 %vm165_vm0, %v152_v10 }
  0x2f   :  { %367 = vmatpush.msrb.mxu2 %v320_v30  ;;  %446 = vmatpush.msrb.mxu3 %v403_v38  ;;  %v1723_v30 = vld [vmem:[#allocation11] ss:$0 sm:$0xff] }
  0x30   :  { %1129 = vmatmul.msk.f32.gmra.mxu2 %vm165_vm0, %v154_v15  ;;  %564 = vmatpush.msra.mxu1 %v1674_v41 }
  0x31   :  { %629 = vmatpush.msra.mxu2 %v1674_v41  ;;  %447 = vmatpush.msrb.mxu3 %v402_v40 }
  0x32   :  { %1131 = vmatmul.msk.f32.gmra.mxu3 %vm165_vm0, %v156_v45  ;;  %565 = vmatpush.msra.mxu1 %v476_v57 }
  0x33   :  { %448 = vmatpush.msrb.mxu3 %v401_v56  ;;  %630 = vmatpush.msra.mxu2 %v476_v57 }
  0x34   :  { %497 = vmatpush.msrb.mxu0 %v475_v58  ;;  %566 = vmatpush.msra.mxu1 %v475_v58 }
  0x35   :  { %694 = vmatpush.msra.mxu3 %v1674_v41  ;;  %631 = vmatpush.msra.mxu2 %v475_v58 }
  0x36   :  { %498 = vmatpush.msrb.mxu0 %v474_v59  ;;  %567 = vmatpush.msra.mxu1 %v474_v59 }
  0x37   :  { %695 = vmatpush.msra.mxu3 %v476_v57  ;;  %1156 = vmatmul.msk.f32.vlgmr.msrb.gmra.mxu0 %vm165_vm0, %v478_v60 }
  0x38   :  { %632 = vmatpush.msra.mxu2 %v474_v59  ;;  %759 = vmatpush.msra.mxu0 %v1674_v41 }
  0x39   :  { %696 = vmatpush.msra.mxu3 %v475_v58 }
  0x3a   :  { %760 = vmatpush.msra.mxu0 %v476_v57 }
  0x3b   :  { %697 = vmatpush.msra.mxu3 %v474_v59 }
  0x3c   :  { %761 = vmatpush.msra.mxu0 %v475_v58 }
  0x3e   :  { %762 = vmatpush.msra.mxu0 %v474_v59 }
  0xa3   :  { %v207_v18 = vpop.f32.mrf.mxu0  ;;  %v213_v22 = vpop.f32.mrf.mxu1 }
  0xa4   :  { %v208_v19 = vadd.f32 %v1649_v16, %v207_v18  ;;  %v214_v25 = vadd.f32 %v1649_v16, %v213_v22 }
  0xa6   :  { %v231_v20 = vmax.f32 %v208_v19, 0.0  ;;  %v233_v26 = vmax.f32 %v214_v25, 0.0 }
  0xa8   :  { %1132 = vmatmul.msk.f32.vlgmr.msrb.gmra.mxu1 %vm165_vm0, %v231_v20 }
  0xa9   :  { %824 = vmatpush.msrb.mxu1 %v1674_v41 }
  0xab   :  { %v210_v21 = vpop.f32.mrf.mxu0  ;;  %v216_v27 = vpop.f32.mrf.mxu1  ;;  %825 = vmatpush.msrb.mxu1 %v476_v57 }
  0xac   :  { %v211_v23 = vadd.f32 %v1649_v16, %v210_v21  ;;  %v217_v28 = vadd.f32 %v1649_v16, %v216_v27  ;;  %v219_v31 = vpop.f32.mrf.mxu2 }
  0xad   :  { %v220_v32 = vadd.f32 %v1649_v16, %v219_v31  ;;  %826 = vmatpush.msrb.mxu1 %v475_v58  ;;  %v225_v0 = vpop.f32.mrf.mxu3 }
  0xae   :  { %v232_v24 = vmax.f32 %v211_v23, 0.0  ;;  %v234_v29 = vmax.f32 %v217_v28, 0.0  ;;  %v226_v2 = vadd.f32 %v1649_v16, %v225_v0 }
  0xaf   :  { %v235_v33 = vmax.f32 %v220_v32, 0.0  ;;  %827 = vmatpush.msrb.mxu1 %v474_v59 }
  0xb0   :  { %1133 = vmatmul.msk.f32.gmra.mxu1 %vm165_vm0, %v232_v24  ;;  %v237_v4 = vmax.f32 %v226_v2, 0.0 }
  0xb4   :  { %v222_v37 = vpop.f32.mrf.mxu2 }
  0xb5   :  { %v223_v39 = vadd.f32 %v1649_v16, %v222_v37  ;;  %v228_v7 = vpop.f32.mrf.mxu3  ;;  %v500_v37 = vpop.f32.mrf.mxu0 }
  0xb6   :  { %v229_v9 = vadd.f32 %v1649_v16, %v228_v7 }
  0xb7   :  { %v236_v43 = vmax.f32 %v223_v39, 0.0 }
  0xb8   :  { %1134 = vmatmul.msk.f32.gmra.mxu1 %vm165_vm0, %v233_v26  ;;  %v238_v11 = vmax.f32 %v229_v9, 0.0 }
  0xc0   :  { %1135 = vmatmul.msk.f32.gmra.mxu1 %vm165_vm0, %v234_v29 }
  0xc8   :  { %1136 = vmatmul.msk.f32.gmra.mxu1 %vm165_vm0, %v235_v33 }
  0xd0   :  { %1137 = vmatmul.msk.f32.gmra.mxu1 %vm165_vm0, %v236_v43 }
  0xd8   :  { %1138 = vmatmul.msk.f32.gmra.mxu1 %vm165_vm0, %v237_v4 }
  0xe0   :  { %1139 = vmatmul.msk.f32.gmra.mxu1 %vm165_vm0, %v238_v11 }
 0x125   :  { %v288_v42 = vpop.f32.mrf.mxu1 }
 0x126   :  { %v289_v44 = vadd.f32 %v1671_v36, %v288_v42 }
 0x128   :  { %v312_v46 = vmax.f32 %v289_v44, 0.0 }
 0x12a   :  { %1140 = vmatmul.msk.f32.vlgmr.msrb.gmra.mxu2 %vm165_vm0, %v312_v46 }
 0x12b   :  { %889 = vmatpush.msrb.mxu2 %v1674_v41 }
 0x12d   :  { %v291_v47 = vpop.f32.mrf.mxu1  ;;  %890 = vmatpush.msrb.mxu2 %v476_v57 }
 0x12e   :  { %v292_v48 = vadd.f32 %v1671_v36, %v291_v47 }
 0x12f   :  { %891 = vmatpush.msrb.mxu2 %v475_v58 }
 0x130   :  { %v313_v49 = vmax.f32 %v292_v48, 0.0 }
 0x131   :  { %892 = vmatpush.msrb.mxu2 %v474_v59 }
 0x132   :  { %1141 = vmatmul.msk.f32.gmra.mxu2 %vm165_vm0, %v313_v49 }
 0x135   :  { %v294_v50 = vpop.f32.mrf.mxu1 }
 0x136   :  { %v295_v51 = vadd.f32 %v1671_v36, %v294_v50 }
 0x138   :  { %v314_v52 = vmax.f32 %v295_v51, 0.0 }
 0x13a   :  { %1142 = vmatmul.msk.f32.gmra.mxu2 %vm165_vm0, %v314_v52 }
 0x13d   :  { %v297_v53 = vpop.f32.mrf.mxu1 }
 0x13e   :  { %v298_v54 = vadd.f32 %v1671_v36, %v297_v53 }
 0x140   :  { %v315_v55 = vmax.f32 %v298_v54, 0.0 }
 0x142   :  { %1143 = vmatmul.msk.f32.gmra.mxu2 %vm165_vm0, %v315_v55 }
 0x145   :  { %v300_v61 = vpop.f32.mrf.mxu1 }
 0x146   :  { %v301_v62 = vadd.f32 %v1671_v36, %v300_v61 }
 0x148   :  { %v316_v63 = vmax.f32 %v301_v62, 0.0 }
 0x14a   :  { %1144 = vmatmul.msk.f32.gmra.mxu2 %vm165_vm0, %v316_v63 }
 0x14d   :  { %v303_v1 = vpop.f32.mrf.mxu1 }
 0x14e   :  { %v304_v3 = vadd.f32 %v1671_v36, %v303_v1 }
 0x150   :  { %v317_v5 = vmax.f32 %v304_v3, 0.0 }
 0x152   :  { %1145 = vmatmul.msk.f32.gmra.mxu2 %vm165_vm0, %v317_v5 }
 0x155   :  { %v306_v22 = vpop.f32.mrf.mxu1 }
 0x156   :  { %v307_v24 = vadd.f32 %v1671_v36, %v306_v22 }
 0x158   :  { %v318_v26 = vmax.f32 %v307_v24, 0.0 }
 0x15a   :  { %1146 = vmatmul.msk.f32.gmra.mxu2 %vm165_vm0, %v318_v26 }
 0x15d   :  { %v309_v28 = vpop.f32.mrf.mxu1 }
 0x15e   :  { %v310_v31 = vadd.f32 %v1671_v36, %v309_v28 }
 0x160   :  { %v319_v33 = vmax.f32 %v310_v31, 0.0 }
 0x162   :  { %1147 = vmatmul.msk.f32.gmra.mxu2 %vm165_vm0, %v319_v33 }
 0x1ad   :  { %v369_v8 = vpop.f32.mrf.mxu2 }
 0x1ae   :  { %v370_v10 = vadd.f32 %v1706_v6, %v369_v8 }
 0x1b0   :  { %v393_v12 = vmax.f32 %v370_v10, 0.0 }
 0x1b2   :  { %1148 = vmatmul.msk.f32.vlgmr.msrb.gmra.mxu3 %vm165_vm0, %v393_v12 }
 0x1b3   :  { %954 = vmatpush.msrb.mxu3 %v1674_v41  ;;  %v479_v41 = vld [vmem:[#allocation12] sm:$0xff] }
 0x1b5   :  { %v372_v13 = vpop.f32.mrf.mxu2  ;;  %955 = vmatpush.msrb.mxu3 %v476_v57 }
 0x1b6   :  { %v373_v14 = vadd.f32 %v1706_v6, %v372_v13 }
 0x1b7   :  { %956 = vmatpush.msrb.mxu3 %v475_v58 }
 0x1b8   :  { %v394_v15 = vmax.f32 %v373_v14, 0.0 }
 0x1b9   :  { %957 = vmatpush.msrb.mxu3 %v474_v59 }
 0x1ba   :  { %1149 = vmatmul.msk.f32.gmra.mxu3 %vm165_vm0, %v394_v15 }
 0x1bd   :  { %v375_v16 = vpop.f32.mrf.mxu2 }
 0x1be   :  { %v376_v17 = vadd.f32 %v1706_v6, %v375_v16 }
 0x1c0   :  { %v395_v18 = vmax.f32 %v376_v17, 0.0 }
 0x1c2   :  { %1150 = vmatmul.msk.f32.gmra.mxu3 %vm165_vm0, %v395_v18 }
 0x1c5   :  { %v378_v19 = vpop.f32.mrf.mxu2 }
 0x1c6   :  { %v379_v20 = vadd.f32 %v1706_v6, %v378_v19 }
 0x1c8   :  { %v396_v21 = vmax.f32 %v379_v20, 0.0 }
 0x1ca   :  { %1151 = vmatmul.msk.f32.gmra.mxu3 %vm165_vm0, %v396_v21 }
 0x1cd   :  { %v381_v23 = vpop.f32.mrf.mxu2 }
 0x1ce   :  { %v382_v25 = vadd.f32 %v1706_v6, %v381_v23 }
 0x1d0   :  { %v397_v27 = vmax.f32 %v382_v25, 0.0 }
 0x1d2   :  { %1152 = vmatmul.msk.f32.gmra.mxu3 %vm165_vm0, %v397_v27 }
 0x1d5   :  { %v384_v29 = vpop.f32.mrf.mxu2 }
 0x1d6   :  { %v385_v32 = vadd.f32 %v1706_v6, %v384_v29 }
 0x1d8   :  { %v398_v34 = vmax.f32 %v385_v32, 0.0 }
 0x1da   :  { %1153 = vmatmul.msk.f32.gmra.mxu3 %vm165_vm0, %v398_v34 }
 0x1dd   :  { %v387_v56 = vpop.f32.mrf.mxu2 }
 0x1de   :  { %v388_v57 = vadd.f32 %v1706_v6, %v387_v56 }
 0x1e0   :  { %v399_v58 = vmax.f32 %v388_v57, 0.0 }
 0x1e2   :  { %1154 = vmatmul.msk.f32.gmra.mxu3 %vm165_vm0, %v399_v58 }
 0x1e5   :  { %v390_v59 = vpop.f32.mrf.mxu2 }
 0x1e6   :  { %v391_v60 = vadd.f32 %v1706_v6, %v390_v59 }
 0x1e8   :  { %v400_v61 = vmax.f32 %v391_v60, 0.0 }
 0x1ea   :  { %1155 = vmatmul.msk.f32.gmra.mxu3 %vm165_vm0, %v400_v61 }
 0x235   :  { %v450_v35 = vpop.f32.mrf.mxu3 }
 0x236   :  { %v451_v38 = vadd.f32 %v1723_v30, %v450_v35 }
 0x238   :  { %v503_v39 = vadd.f32 %v500_v37, %v451_v38 }
 0x23a   :  { %1209 = vtanh.f32 %v503_v39  ;;  %v1157_v36 = vmul.f32 -1.442695, %v503_v39 }
 0x23c   :  { %1211 = vpow2.f32 %v1157_v36 }
 0x23d   :  { %v453_v6 = vpop.f32.mrf.mxu3 }
 0x23e   :  { %v454_v7 = vadd.f32 %v1723_v30, %v453_v6 }
 0x240   :  { %v1210_v40 = vpop.eup %1209 }
 0x241   :  { %530 = vrot.lane.b32.xlu0 %v1210_v40, %s1484_s10 }
 0x242   :  { %v1212_v42 = vpop.eup %1211 }
 0x243   :  { %v507_v43 = vadd.f32 1.0, %v1212_v42 }
 0x245   :  { %1213 = vrcp.f32 %v507_v43  ;;  %v519_v49 = vand.u32 2147483648, %v507_v43  ;;  %vm513_vm2 = vweird.f32 %v507_v43  ;;  %v517_v50 = vand.u32 2147483647, %v507_v43  ;;  %v456_v34 = vpop.f32.mrf.mxu3 }
 0x246   :  { %v457_v35 = vadd.f32 %v1723_v30, %v456_v34 }
 0x247   :  { %v520_v52 = vor.u32 1.1754944e-38, %v519_v49  ;;  %vm518_vm4 = vcmp.eq.f32.partialorder %v517_v50, 8.507059e+37 }
 0x249   :  { %525 = vrot.lane.b32.xlu0 %v479_v41, %s1485_s27 }
 0x24b   :  { %v1214_v44 = vpop.eup %1213 }
 0x24c   :  { %v509_v45 = vmul.f32 %v1214_v44, %v507_v43  ;;  %vm514_vm1 = vweird.f32 %v1214_v44 }
 0x24d   :  { %vm515_vm3 = vmor %vm513_vm2, %vm514_vm1  ;;  %v459_v61 = vpop.f32.mrf.mxu3 }
 0x24e   :  { %v510_v46 = vsub.f32 1.0, %v509_v45 }
 0x250   :  { %v511_v47 = vmul.f32 %v1214_v44, %v510_v46 }
 0x252   :  { %v512_v48 = vadd.f32 %v1214_v44, %v511_v47 }
 0x254   :  { %v516_v51 = vsel %vm515_vm3, %v1214_v44, %v512_v48 }
 0x255   :  { %v521_v54 = vsel %vm518_vm4, %v520_v52, %v516_v51 }
 0x2b3   :  { %v531_v53 = vpop.permute.xlu0 %530 }
 0x2b4   :  { %v533_v55 = vmul.f32 %v531_v53, %v521_v54 }
 0x2b6   :  { %535 = vrot.lane.b32.xlu1 %v533_v55, %s1485_s27 }
 0x2bb   :  { %v526_v62 = vpop.permute.xlu0 %525 }
 0x2bc   :  { %v528_v63 = vmul.f32 %v526_v62, %v521_v54  ;;  %v462_v62 = vpop.f32.mrf.mxu3 }
 0x328   :  { %v536_v0 = vpop.permute.xlu1 %535 }
 0x329   :  { %v538_v1 = vadd.f32 %v536_v0, %v528_v63  ;;  %v1755_v63 = vpop.f32.mrf.mxu3 }
 0x32b   :  { %1215 = vtanh.f32 %v538_v1 }
 0x331   :  { %v1216_v2 = vpop.eup %1215  ;;  %v1757_v0 = vpop.f32.mrf.mxu3 }
 0x332   :  { %541 = vrot.lane.b32.xlu1 %v1216_v2, %s1484_s10  ;;  %v460_v2 = vadd.f32 %v1723_v30, %v459_v61 }
 0x3a4   :  { %v542_v3 = vpop.permute.xlu1 %541 }
 0x3a5   :  { %v544_v4 = vmul.f32 %v542_v3, %v521_v54 }
 0x3a7   :  { %546 = vrot.lane.b32.xlu2 %v544_v4, %s1485_s27 }
 0x401   :  { %v547_v5 = vpop.permute.xlu2 %546 }
 0x402   :  { %549 = vst.msk [vmem:[#allocation2] sm:$0xff] %vm165_vm0, %v547_v5  ;;  %1158 = vmatmul.msk.f32.vlgmr.msra.gmra.mxu1 %vm165_vm0, %v547_v5 }
 0x47f   :  { %v569_v8 = vpop.f32.mrf.mxu1 }
 0x480   :  { %v572_v9 = vadd.f32 %v569_v8, %v454_v7 }
 0x482   :  { %1217 = vtanh.f32 %v572_v9  ;;  %v1159_v11 = vmul.f32 -1.442695, %v572_v9 }
 0x484   :  { %1219 = vpow2.f32 %v1159_v11 }
 0x488   :  { %v1218_v10 = vpop.eup %1217 }
 0x489   :  { %595 = vrot.lane.b32.xlu2 %v1218_v10, %s1484_s10 }
 0x48a   :  { %v1220_v12 = vpop.eup %1219 }
 0x48b   :  { %v576_v13 = vadd.f32 1.0, %v1220_v12 }
 0x48d   :  { %1221 = vrcp.f32 %v576_v13  ;;  %v588_v19 = vand.u32 2147483648, %v576_v13  ;;  %vm582_vm6 = vweird.f32 %v576_v13  ;;  %v586_v20 = vand.u32 2147483647, %v576_v13 }
 0x48f   :  { %v589_v22 = vor.u32 1.1754944e-38, %v588_v19  ;;  %vm587_vm8 = vcmp.eq.f32.partialorder %v586_v20, 8.507059e+37 }
 0x493   :  { %v1222_v14 = vpop.eup %1221 }
 0x494   :  { %v578_v15 = vmul.f32 %v1222_v14, %v576_v13  ;;  %vm583_vm5 = vweird.f32 %v1222_v14 }
 0x495   :  { %vm584_vm7 = vmor %vm582_vm6, %vm583_vm5 }
 0x496   :  { %v579_v16 = vsub.f32 1.0, %v578_v15 }
 0x498   :  { %v580_v17 = vmul.f32 %v1222_v14, %v579_v16 }
 0x49a   :  { %v581_v18 = vadd.f32 %v1222_v14, %v580_v17 }
 0x49c   :  { %v585_v21 = vsel %vm584_vm7, %v1222_v14, %v581_v18 }
 0x49d   :  { %v590_v24 = vsel %vm587_vm8, %v589_v22, %v585_v21 }
 0x49e   :  { %v593_v26 = vmul.f32 %v590_v24, %v538_v1  ;;  %v1759_v1 = vpop.f32.mrf.mxu3 }
 0x4e3   :  { %v596_v23 = vpop.permute.xlu2 %595 }
 0x4e4   :  { %v598_v25 = vmul.f32 %v596_v23, %v590_v24 }
 0x4e6   :  { %600 = vrot.lane.b32.xlu0 %v598_v25, %s1485_s27 }
 0x558   :  { %v601_v27 = vpop.permute.xlu0 %600 }
 0x559   :  { %v603_v28 = vadd.f32 %v601_v27, %v593_v26  ;;  %v1016_v27 = vld [vmem:[#allocation14 + $0x18] sm:$0xff] }
 0x55a   :  { %1057 = vmatpush.msrb.mxu0 %v1016_v27 }
 0x55b   :  { %1223 = vtanh.f32 %v603_v28 }
 0x561   :  { %v1224_v29 = vpop.eup %1223 }
 0x562   :  { %606 = vrot.lane.b32.xlu1 %v1224_v29, %s1484_s10  ;;  %v1014_v29 = vld [vmem:[#allocation14 + $0x8] sm:$0xff] }
 0x5d4   :  { %v607_v31 = vpop.permute.xlu1 %606 }
 0x5d5   :  { %v609_v32 = vmul.f32 %v607_v31, %v590_v24  ;;  %v1013_v31 = vld [vmem:[#allocation14] sm:$0xff] }
 0x5d7   :  { %611 = vrot.lane.b32.xlu2 %v609_v32, %s1485_s27 }
 0x631   :  { %v612_v33 = vpop.permute.xlu2 %611 }
 0x632   :  { %614 = vst.msk [vmem:[#allocation2 + $0x8] sm:$0xff] %vm165_vm0, %v612_v33  ;;  %1160 = vmatmul.msk.f32.vlgmr.msra.gmra.mxu2 %vm165_vm0, %v612_v33  ;;  %v1005_v33 = vld [vmem:[#allocation2] sm:$0xff] }
 0x639   :  { %v1006_v34 = vld [vmem:[#allocation2 + $0x8] sm:$0xff] }
 0x6b5   :  { %v634_v37 = vpop.f32.mrf.mxu2 }
 0x6b6   :  { %v637_v38 = vadd.f32 %v634_v37, %v457_v35 }
 0x6b8   :  { %1225 = vtanh.f32 %v637_v38  ;;  %v1161_v40 = vmul.f32 -1.442695, %v637_v38  ;;  %v463_v38 = vadd.f32 %v1723_v30, %v462_v62 }
 0x6ba   :  { %1227 = vpow2.f32 %v1161_v40 }
 0x6be   :  { %v1226_v39 = vpop.eup %1225 }
 0x6bf   :  { %660 = vrot.lane.b32.xlu0 %v1226_v39, %s1484_s10 }
 0x6c0   :  { %v1228_v41 = vpop.eup %1227 }
 0x6c1   :  { %v641_v36 = vadd.f32 1.0, %v1228_v41  ;;  %v1779_v41 = vld [vmem:[%s1842_s13] ss:$0 sm:$0xff]  ;;  %s1486_s13 = smov [#allocation15]  }
 0x6c2   :  { %s1106_s29 = sshll.u32 %s1486_s13, 4  ;;  %s1107_s29 = int_to_ptr.vmem [resolvable:$true] %s1106_s29 }
 0x6c3   :  { %1229 = vrcp.f32 %v641_v36  ;;  %v653_v47 = vand.u32 2147483648, %v641_v36  ;;  %vm647_vm10 = vweird.f32 %v641_v36  ;;  %v651_v48 = vand.u32 2147483647, %v641_v36 }
 0x6c5   :  { %v654_v50 = vor.u32 1.1754944e-38, %v653_v47  ;;  %vm652_vm12 = vcmp.eq.f32.partialorder %v651_v48, 8.507059e+37 }
 0x6c9   :  { %v1230_v42 = vpop.eup %1229 }
 0x6ca   :  { %v643_v43 = vmul.f32 %v1230_v42, %v641_v36  ;;  %vm648_vm9 = vweird.f32 %v1230_v42 }
 0x6cb   :  { %vm649_vm11 = vmor %vm647_vm10, %vm648_vm9 }
 0x6cc   :  { %v644_v44 = vsub.f32 1.0, %v643_v43 }
 0x6ce   :  { %v645_v45 = vmul.f32 %v1230_v42, %v644_v44 }
 0x6d0   :  { %v646_v46 = vadd.f32 %v1230_v42, %v645_v45 }
 0x6d2   :  { %v650_v49 = vsel %vm649_vm11, %v1230_v42, %v646_v46 }
 0x6d3   :  { %v655_v52 = vsel %vm652_vm12, %v654_v50, %v650_v49 }
 0x6d4   :  { %v658_v54 = vmul.f32 %v655_v52, %v603_v28  ;;  %v1015_v28 = vld [vmem:[#allocation14 + $0x10] sm:$0xff] }
 0x6d5   :  { %1058 = vmatpush.msrb.mxu0 %v1015_v28 }
 0x6d7   :  { %1059 = vmatpush.msrb.mxu0 %v1014_v29 }
 0x6d9   :  { %1060 = vmatpush.msrb.mxu0 %v1013_v31 }
 0x731   :  { %v661_v51 = vpop.permute.xlu0 %660 }
 0x732   :  { %v663_v53 = vmul.f32 %v661_v51, %v655_v52 }
 0x734   :  { %665 = vrot.lane.b32.xlu1 %v663_v53, %s1485_s27 }
 0x7a6   :  { %v666_v55 = vpop.permute.xlu1 %665 }
 0x7a7   :  { %v668_v56 = vadd.f32 %v666_v55, %v658_v54 }
 0x7a9   :  { %1231 = vtanh.f32 %v668_v56 }
 0x7af   :  { %v1232_v57 = vpop.eup %1231 }
 0x7b0   :  { %671 = vrot.lane.b32.xlu2 %v1232_v57, %s1484_s10 }
 0x80a   :  { %v672_v58 = vpop.permute.xlu2 %671 }
 0x80b   :  { %v674_v59 = vmul.f32 %v672_v58, %v655_v52 }
 0x80d   :  { %676 = vrot.lane.b32.xlu0 %v674_v59, %s1485_s27 }
 0x87f   :  { %v677_v60 = vpop.permute.xlu0 %676 }
 0x880   :  { %679 = vst.msk [vmem:[#allocation2 + $0x10] sm:$0xff] %vm165_vm0, %v677_v60  ;;  %1162 = vmatmul.msk.f32.vlgmr.msra.gmra.mxu3 %vm165_vm0, %v677_v60 }
 0x887   :  { %v1007_v35 = vld [vmem:[#allocation2 + $0x10] sm:$0xff] }
 0x903   :  { %v699_v3 = vpop.f32.mrf.mxu3 }
 0x904   :  { %v702_v4 = vadd.f32 %v699_v3, %v460_v2 }
 0x906   :  { %1233 = vtanh.f32 %v702_v4  ;;  %v1163_v6 = vmul.f32 -1.442695, %v702_v4 }
 0x908   :  { %1235 = vpow2.f32 %v1163_v6 }
 0x90c   :  { %v1234_v5 = vpop.eup %1233 }
 0x90d   :  { %725 = vrot.lane.b32.xlu1 %v1234_v5, %s1484_s10 }
 0x90e   :  { %v1236_v7 = vpop.eup %1235 }
 0x90f   :  { %v706_v8 = vadd.f32 1.0, %v1236_v7 }
 0x911   :  { %1237 = vrcp.f32 %v706_v8  ;;  %v718_v14 = vand.u32 2147483648, %v706_v8  ;;  %vm712_vm14 = vweird.f32 %v706_v8  ;;  %v716_v15 = vand.u32 2147483647, %v706_v8 }
 0x913   :  { %v719_v17 = vor.u32 1.1754944e-38, %v718_v14  ;;  %vm717_vm1 = vcmp.eq.f32.partialorder %v716_v15, 8.507059e+37 }
 0x917   :  { %v1238_v9 = vpop.eup %1237 }
 0x918   :  { %v708_v10 = vmul.f32 %v1238_v9, %v706_v8  ;;  %vm713_vm13 = vweird.f32 %v1238_v9 }
 0x919   :  { %vm714_vm15 = vmor %vm712_vm14, %vm713_vm13 }
 0x91a   :  { %v709_v11 = vsub.f32 1.0, %v708_v10 }
 0x91c   :  { %v710_v12 = vmul.f32 %v1238_v9, %v709_v11 }
 0x91e   :  { %v711_v13 = vadd.f32 %v1238_v9, %v710_v12 }
 0x920   :  { %v715_v16 = vsel %vm714_vm15, %v1238_v9, %v711_v13 }
 0x921   :  { %v720_v19 = vsel %vm717_vm1, %v719_v17, %v715_v16  ;;  %v466_v16 = vadd.f32 %v1723_v30, %v1755_v63 }
 0x922   :  { %v723_v21 = vmul.f32 %v720_v19, %v668_v56 }
 0x97f   :  { %v726_v18 = vpop.permute.xlu1 %725 }
 0x980   :  { %v728_v20 = vmul.f32 %v726_v18, %v720_v19 }
 0x982   :  { %730 = vrot.lane.b32.xlu2 %v728_v20, %s1485_s27 }
 0x9dc   :  { %v731_v22 = vpop.permute.xlu2 %730 }
 0x9dd   :  { %v1764_v23 = vadd.f32 %v731_v22, %v723_v21 }
 0x9df   :  { %1239 = vtanh.f32 %v1764_v23 }
 0x9e5   :  { %v1240_v24 = vpop.eup %1239 }
 0x9e6   :  { %736 = vrot.lane.b32.xlu0 %v1240_v24, %s1484_s10 }
 0xa58   :  { %v737_v25 = vpop.permute.xlu0 %736 }
 0xa59   :  { %v739_v26 = vmul.f32 %v737_v25, %v720_v19 }
 0xa5b   :  { %741 = vrot.lane.b32.xlu1 %v739_v26, %s1485_s27 }
 0xacd   :  { %v742_v32 = vpop.permute.xlu1 %741 }
 0xace   :  { %744 = vst.msk [vmem:[#allocation2 + $0x18] sm:$0xff] %vm165_vm0, %v742_v32  ;;  %1164 = vmatmul.msk.f32.vlgmr.msra.gmra.mxu0 %vm165_vm0, %v742_v32 }
 0xad5   :  { %v1008_v37 = vld [vmem:[#allocation2 + $0x18] sm:$0xff] }
 0xad6   :  { %1172 = vmatmul.msk.f32.vlgmr.msrb.gmra.mxu0 %vm165_vm0, %v1005_v33 }
 0xade   :  { %1173 = vmatmul.msk.f32.gmra.mxu0 %vm165_vm0, %v1006_v34 }
 0xae6   :  { %1174 = vmatmul.msk.f32.gmra.mxu0 %vm165_vm0, %v1007_v35 }
 0xaee   :  { %1175 = vmatmul.msk.f32.gmra.mxu0 %vm165_vm0, %v1008_v37 }
 0xb4b   :  { %v764_v39 = vpop.f32.mrf.mxu0 }
 0xb4c   :  { %v767_v40 = vadd.f32 %v764_v39, %v463_v38 }
 0xb4e   :  { %1241 = vtanh.f32 %v767_v40  ;;  %v1165_v54 = vmul.f32 -1.442695, %v767_v40 }
 0xb50   :  { %1243 = vpow2.f32 %v1165_v54 }
 0xb53   :  { %v1062_v36 = vpop.f32.mrf.mxu0 }
 0xb54   :  { %v1242_v42 = vpop.eup %1241  ;;  %v1063_v43 = vadd.f32 %v1779_v41, %v1062_v36 }
 0xb55   :  { %790 = vrot.lane.b32.xlu2 %v1242_v42, %s1484_s10 }
 0xb56   :  { %v1086_v44 = vmax.f32 %v1063_v43, 0.0  ;;  %v1244_v55 = vpop.eup %1243 }
 0xb57   :  { %v771_v56 = vadd.f32 1.0, %v1244_v55 }
 0xb58   :  { %1094 = vst [vmem:[#allocation15] sm:$0xff] %v1086_v44 }
 0xb59   :  { %1245 = vrcp.f32 %v771_v56  ;;  %v783_v62 = vand.u32 2147483648, %v771_v56  ;;  %vm777_vm3 = vweird.f32 %v771_v56  ;;  %v781_v2 = vand.u32 2147483647, %v771_v56 }
 0xb5b   :  { %v1065_v45 = vpop.f32.mrf.mxu0  ;;  %v784_v4 = vor.u32 1.1754944e-38, %v783_v62  ;;  %vm782_vm5 = vcmp.eq.f32.partialorder %v781_v2, 8.507059e+37 }
 0xb5c   :  { %v1066_v46 = vadd.f32 %v1779_v41, %v1065_v45 }
 0xb5e   :  { %v1087_v47 = vmax.f32 %v1066_v46, 0.0 }
 0xb5f   :  { %v1246_v57 = vpop.eup %1245 }
 0xb60   :  { %1095 = vst [vmem:[#allocation15 + $0x8] sm:$0xff] %v1087_v47  ;;  %v773_v58 = vmul.f32 %v1246_v57, %v771_v56  ;;  %vm778_vm2 = vweird.f32 %v1246_v57  ;;  %v469_v47 = vadd.f32 %v1723_v30, %v1757_v0 }
 0xb61   :  { %vm779_vm4 = vmor %vm777_vm3, %vm778_vm2 }
 0xb62   :  { %v774_v59 = vsub.f32 1.0, %v773_v58 }
 0xb63   :  { %v1068_v48 = vpop.f32.mrf.mxu0 }
 0xb64   :  { %v1069_v49 = vadd.f32 %v1779_v41, %v1068_v48  ;;  %v775_v60 = vmul.f32 %v1246_v57, %v774_v59 }
 0xb66   :  { %v1088_v50 = vmax.f32 %v1069_v49, 0.0  ;;  %v776_v61 = vadd.f32 %v1246_v57, %v775_v60 }
 0xb68   :  { %1096 = vst [vmem:[#allocation15 + $0x10] sm:$0xff] %v1088_v50  ;;  %v780_v3 = vsel %vm779_vm4, %v1246_v57, %v776_v61 }
 0xb69   :  { %v785_v6 = vsel %vm782_vm5, %v784_v4, %v780_v3 }
 0xb6a   :  { %v788_v8 = vmul.f32 %v785_v6, %v1764_v23 }
 0xb6b   :  { %v1071_v51 = vpop.f32.mrf.mxu0 }
 0xb6c   :  { %v1072_v52 = vadd.f32 %v1779_v41, %v1071_v51 }
 0xb6e   :  { %v1089_v53 = vmax.f32 %v1072_v52, 0.0 }
 0xb70   :  { %1097 = vst [vmem:[#allocation15 + $0x18] sm:$0xff] %v1089_v53 }
 0xbaf   :  { %v791_v5 = vpop.permute.xlu2 %790 }
 0xbb0   :  { %v793_v7 = vmul.f32 %v791_v5, %v785_v6 }
 0xbb2   :  { %795 = vrot.lane.b32.xlu0 %v793_v7, %s1485_s27 }
 0xc24   :  { %v796_v9 = vpop.permute.xlu0 %795 }
 0xc25   :  { %v798_v10 = vadd.f32 %v796_v9, %v788_v8 }
 0xc27   :  { %1247 = vtanh.f32 %v798_v10 }
 0xc2d   :  { %v1248_v11 = vpop.eup %1247 }
 0xc2e   :  { %801 = vrot.lane.b32.xlu1 %v1248_v11, %s1484_s10 }
 0xca0   :  { %v802_v12 = vpop.permute.xlu1 %801 }
 0xca1   :  { %v804_v13 = vmul.f32 %v802_v12, %v785_v6 }
 0xca3   :  { %806 = vrot.lane.b32.xlu2 %v804_v13, %s1485_s27 }
 0xcfd   :  { %v807_v14 = vpop.permute.xlu2 %806 }
 0xcfe   :  { %809 = vst.msk [vmem:[#allocation2 + $0x20] sm:$0xff] %vm165_vm0, %v807_v14  ;;  %1166 = vmatmul.msk.f32.vlgmr.msrb.gmra.mxu1 %vm165_vm0, %v807_v14 }
 0xd05   :  { %v1009_v15 = vld [vmem:[#allocation2 + $0x20] sm:$0xff] }
 0xd06   :  { %1176 = vmatmul.msk.f32.gmra.mxu0 %vm165_vm0, %v1009_v15  ;;  %v472_v15 = vadd.f32 %v1723_v30, %v1759_v1 }
 0xd7b   :  { %v829_v17 = vpop.f32.mrf.mxu1 }
 0xd7c   :  { %v832_v18 = vadd.f32 %v829_v17, %v466_v16 }
 0xd7e   :  { %1249 = vtanh.f32 %v832_v18  ;;  %v1167_v23 = vmul.f32 -1.442695, %v832_v18 }
 0xd80   :  { %1251 = vpow2.f32 %v1167_v23 }
 0xd83   :  { %v1074_v19 = vpop.f32.mrf.mxu0 }
 0xd84   :  { %v1250_v20 = vpop.eup %1249  ;;  %v1075_v21 = vadd.f32 %v1779_v41, %v1074_v19 }
 0xd85   :  { %855 = vrot.lane.b32.xlu0 %v1250_v20, %s1484_s10 }
 0xd86   :  { %v1090_v22 = vmax.f32 %v1075_v21, 0.0  ;;  %v1252_v24 = vpop.eup %1251 }
 0xd87   :  { %v836_v25 = vadd.f32 1.0, %v1252_v24 }
 0xd88   :  { %1098 = vst [vmem:[#allocation15 + $0x20] sm:$0xff] %v1090_v22 }
 0xd89   :  { %1253 = vrcp.f32 %v836_v25  ;;  %v848_v31 = vand.u32 2147483648, %v836_v25  ;;  %vm842_vm7 = vweird.f32 %v836_v25  ;;  %v846_v32 = vand.u32 2147483647, %v836_v25 }
 0xd8b   :  { %v849_v34 = vor.u32 1.1754944e-38, %v848_v31  ;;  %vm847_vm9 = vcmp.eq.f32.partialorder %v846_v32, 8.507059e+37 }
 0xd8f   :  { %v1254_v26 = vpop.eup %1253 }
 0xd90   :  { %v838_v27 = vmul.f32 %v1254_v26, %v836_v25  ;;  %vm843_vm6 = vweird.f32 %v1254_v26 }
 0xd91   :  { %vm844_vm8 = vmor %vm842_vm7, %vm843_vm6 }
 0xd92   :  { %v839_v28 = vsub.f32 1.0, %v838_v27 }
 0xd94   :  { %v840_v63 = vmul.f32 %v1254_v26, %v839_v28 }
 0xd96   :  { %v841_v29 = vadd.f32 %v1254_v26, %v840_v63 }
 0xd98   :  { %v845_v33 = vsel %vm844_vm8, %v1254_v26, %v841_v29 }
 0xd99   :  { %v850_v37 = vsel %vm847_vm9, %v849_v34, %v845_v33 }
 0xd9a   :  { %v853_v39 = vmul.f32 %v850_v37, %v798_v10 }
 0xdf7   :  { %v856_v35 = vpop.permute.xlu0 %855 }
 0xdf8   :  { %v858_v38 = vmul.f32 %v856_v35, %v850_v37 }
 0xdfa   :  { %860 = vrot.lane.b32.xlu1 %v858_v38, %s1485_s27 }
 0xe6c   :  { %v861_v40 = vpop.permute.xlu1 %860 }
 0xe6d   :  { %v863_v36 = vadd.f32 %v861_v40, %v853_v39 }
 0xe6f   :  { %1255 = vtanh.f32 %v863_v36 }
 0xe75   :  { %v1256_v42 = vpop.eup %1255 }
 0xe76   :  { %866 = vrot.lane.b32.xlu2 %v1256_v42, %s1484_s10 }
 0xed0   :  { %v867_v43 = vpop.permute.xlu2 %866 }
 0xed1   :  { %v869_v44 = vmul.f32 %v867_v43, %v850_v37 }
 0xed3   :  { %871 = vrot.lane.b32.xlu0 %v869_v44, %s1485_s27 }
 0xf45   :  { %v872_v45 = vpop.permute.xlu0 %871 }
 0xf46   :  { %874 = vst.msk [vmem:[#allocation2 + $0x28] sm:$0xff] %vm165_vm0, %v872_v45  ;;  %1168 = vmatmul.msk.f32.vlgmr.msrb.gmra.mxu2 %vm165_vm0, %v872_v45 }
 0xf4d   :  { %v1010_v46 = vld [vmem:[#allocation2 + $0x28] sm:$0xff] }
 0xf4e   :  { %1177 = vmatmul.msk.f32.gmra.mxu0 %vm165_vm0, %v1010_v46 }
 0xfc9   :  { %v894_v48 = vpop.f32.mrf.mxu2 }
 0xfca   :  { %v897_v49 = vadd.f32 %v894_v48, %v469_v47 }
 0xfcb   :  { %v1077_v50 = vpop.f32.mrf.mxu0 }
 0xfcc   :  { %1257 = vtanh.f32 %v897_v49  ;;  %v1078_v51 = vadd.f32 %v1779_v41, %v1077_v50  ;;  %v1169_v54 = vmul.f32 -1.442695, %v897_v49 }
 0xfce   :  { %v1091_v52 = vmax.f32 %v1078_v51, 0.0  ;;  %1259 = vpow2.f32 %v1169_v54 }
 0xfd0   :  { %1099 = vst [vmem:[#allocation15 + $0x28] sm:$0xff] %v1091_v52 }
 0xfd2   :  { %v1258_v53 = vpop.eup %1257 }
 0xfd3   :  { %920 = vrot.lane.b32.xlu1 %v1258_v53, %s1484_s10 }
 0xfd4   :  { %v1260_v55 = vpop.eup %1259 }
 0xfd5   :  { %v901_v56 = vadd.f32 1.0, %v1260_v55 }
 0xfd7   :  { %1261 = vrcp.f32 %v901_v56  ;;  %v913_v61 = vand.u32 2147483648, %v901_v56  ;;  %vm907_vm11 = vweird.f32 %v901_v56  ;;  %v911_v62 = vand.u32 2147483647, %v901_v56 }
 0xfd9   :  { %v914_v3 = vor.u32 1.1754944e-38, %v913_v61  ;;  %vm912_vm13 = vcmp.eq.f32.partialorder %v911_v62, 8.507059e+37 }
 0xfdd   :  { %v1262_v57 = vpop.eup %1261 }
 0xfde   :  { %v903_v58 = vmul.f32 %v1262_v57, %v901_v56  ;;  %vm908_vm10 = vweird.f32 %v1262_v57 }
 0xfdf   :  { %vm909_vm12 = vmor %vm907_vm11, %vm908_vm10 }
 0xfe0   :  { %v904_v59 = vsub.f32 1.0, %v903_v58 }
 0xfe2   :  { %v905_v0 = vmul.f32 %v1262_v57, %v904_v59 }
 0xfe4   :  { %v906_v60 = vadd.f32 %v1262_v57, %v905_v0 }
 0xfe6   :  { %v910_v2 = vsel %vm909_vm12, %v1262_v57, %v906_v60 }
 0xfe7   :  { %v915_v5 = vsel %vm912_vm13, %v914_v3, %v910_v2 }
 0xfe8   :  { %v918_v7 = vmul.f32 %v915_v5, %v863_v36 }
0x1045   :  { %v921_v4 = vpop.permute.xlu1 %920 }
0x1046   :  { %v923_v6 = vmul.f32 %v921_v4, %v915_v5 }
0x1048   :  { %925 = vrot.lane.b32.xlu2 %v923_v6, %s1485_s27 }
0x10a2   :  { %v926_v8 = vpop.permute.xlu2 %925 }
0x10a3   :  { %v928_v9 = vadd.f32 %v926_v8, %v918_v7 }
0x10a5   :  { %1263 = vtanh.f32 %v928_v9 }
0x10ab   :  { %v1264_v10 = vpop.eup %1263 }
0x10ac   :  { %931 = vrot.lane.b32.xlu0 %v1264_v10, %s1484_s10 }
0x111e   :  { %v932_v11 = vpop.permute.xlu0 %931 }
0x111f   :  { %v934_v12 = vmul.f32 %v932_v11, %v915_v5 }
0x1121   :  { %936 = vrot.lane.b32.xlu1 %v934_v12, %s1485_s27 }
0x1193   :  { %v937_v13 = vpop.permute.xlu1 %936 }
0x1194   :  { %939 = vst.msk [vmem:[#allocation2 + $0x30] sm:$0xff] %vm165_vm0, %v937_v13  ;;  %1170 = vmatmul.msk.f32.vlgmr.msrb.gmra.mxu3 %vm165_vm0, %v937_v13 }
0x119b   :  { %v1011_v14 = vld [vmem:[#allocation2 + $0x30] sm:$0xff] }
0x119c   :  { %1178 = vmatmul.msk.f32.gmra.mxu0 %vm165_vm0, %v1011_v14 }
0x1217   :  { %v959_v16 = vpop.f32.mrf.mxu3 }
0x1218   :  { %v962_v17 = vadd.f32 %v959_v16, %v472_v15 }
0x1219   :  { %v1080_v18 = vpop.f32.mrf.mxu0 }
0x121a   :  { %1265 = vtanh.f32 %v962_v17  ;;  %v1081_v19 = vadd.f32 %v1779_v41, %v1080_v18  ;;  %v1171_v22 = vmul.f32 -1.442695, %v962_v17 }
0x121c   :  { %v1092_v20 = vmax.f32 %v1081_v19, 0.0  ;;  %1267 = vpow2.f32 %v1171_v22 }
0x121e   :  { %1100 = vst [vmem:[#allocation15 + $0x30] sm:$0xff] %v1092_v20 }
0x1220   :  { %v1266_v21 = vpop.eup %1265 }
0x1221   :  { %985 = vrot.lane.b32.xlu2 %v1266_v21, %s1484_s10 }
0x1222   :  { %v1268_v23 = vpop.eup %1267 }
0x1223   :  { %v966_v24 = vadd.f32 1.0, %v1268_v23 }
0x1225   :  { %1269 = vrcp.f32 %v966_v24  ;;  %v978_v28 = vand.u32 2147483648, %v966_v24  ;;  %vm972_vm15 = vweird.f32 %v966_v24  ;;  %v976_v63 = vand.u32 2147483647, %v966_v24 }
0x1227   :  { %v979_v31 = vor.u32 1.1754944e-38, %v978_v28  ;;  %vm977_vm2 = vcmp.eq.f32.partialorder %v976_v63, 8.507059e+37 }
0x122b   :  { %v1270_v25 = vpop.eup %1269 }
0x122c   :  { %v968_v26 = vmul.f32 %v1270_v25, %v966_v24  ;;  %vm973_vm14 = vweird.f32 %v1270_v25 }
0x122d   :  { %vm974_vm1 = vmor %vm972_vm15, %vm973_vm14 }
0x122e   :  { %v969_v27 = vsub.f32 1.0, %v968_v26 }
0x1230   :  { %v970_v30 = vmul.f32 %v1270_v25, %v969_v27 }
0x1232   :  { %v971_v1 = vadd.f32 %v1270_v25, %v970_v30 }
0x1234   :  { %v975_v29 = vsel %vm974_vm1, %v1270_v25, %v971_v1 }
0x1235   :  { %v980_v33 = vsel %vm977_vm2, %v979_v31, %v975_v29 }
0x1236   :  { %v983_v35 = vmul.f32 %v980_v33, %v928_v9 }
0x127b   :  { %v986_v32 = vpop.permute.xlu2 %985 }
0x127c   :  { %v988_v34 = vmul.f32 %v986_v32, %v980_v33 }
0x127e   :  { %990 = vrot.lane.b32.xlu0 %v988_v34, %s1485_s27 }
0x12f0   :  { %v991_v37 = vpop.permute.xlu0 %990 }
0x12f1   :  { %v993_v38 = vadd.f32 %v991_v37, %v983_v35 }
0x12f3   :  { %1271 = vtanh.f32 %v993_v38 }
0x12f9   :  { %v1272_v39 = vpop.eup %1271 }
0x12fa   :  { %996 = vrot.lane.b32.xlu1 %v1272_v39, %s1484_s10 }
0x136c   :  { %v997_v40 = vpop.permute.xlu1 %996 }
0x136d   :  { %v999_v36 = vmul.f32 %v997_v40, %v980_v33 }
0x136f   :  { %1001 = vrot.lane.b32.xlu2 %v999_v36, %s1485_s27 }
0x13c9   :  { %v1002_v42 = vpop.permute.xlu2 %1001 }
0x13ca   :  { %1004 = vst.msk [vmem:[#allocation2 + $0x38] sm:$0xff] %vm165_vm0, %v1002_v42 }
0x13d1   :  { %v1012_v43 = vld [vmem:[#allocation2 + $0x38] sm:$0xff] }
0x13d2   :  { %1179 = vmatmul.msk.f32.gmra.mxu0 %vm165_vm0, %v1012_v43 }
0x144f   :  { %v1083_v44 = vpop.f32.mrf.mxu0 }
0x1450   :  { %v1084_v45 = vadd.f32 %v1779_v41, %v1083_v44 }
0x1452   :  { %v1093_v46 = vmax.f32 %v1084_v45, 0.0 }
0x1454   :  { %1101 = vst [vmem:[#allocation15 + $0x38] sm:$0xff] %v1093_v46 }
0x1455   :  { %1114 = dma.vmem_to_hbm [thread:$0]  %s1107_s29, 1024, %s1109_s8, [#allocation5], %s1477_s6, %s1477_s6, %s1478_s26  }
0x1456   :  { %1473 = dma.done.wait [#allocation5], 1024  }
0x1457   :  { %1474 = vsyncadd [#allocation5], 4294966272 }
0x1458   :  { %1119 = vsyncpa [#allocation4], 1 }
0x1459   :  { %1120 = vsyncpa [#allocation7], 1 }
0x145a   :  { %1121 = vsyncpa [#allocation10], 1 }
0x145b   :  { %1122 = vsyncpa [#allocation13], 1 }
0x145c   :  { %1123 = vsyncpa [#allocation5], 1 }

</bundles_post_ra>
